<compile_context>
chip_gen: v5e
topology: v5e:2x2
jax: 0.10.0
libtpu: 0.0.40
codegen_flags: <defaults>
</compile_context>

<pallas_src>
import functools

import jax
import jax.numpy as jnp
from jax import lax
from jax.experimental import pallas as pl
from jax.experimental.pallas import tpu as pltpu


def _round_up(x, m):
    return (x + m - 1) // m * m


# ----------------------------- Pallas kernel --------------------------------

def _reward_head_kernel(x_ref, w_ref, out_ref, *, tile_h):
    """One (batch-tile i, H-tile k) grid step of the fused reward head.

    x_ref   : (tile_b, tile_h) bf16 VMEM -- last-token hidden rows (natural layout)
    w_ref   : (h_pad, 1)       bf16 VMEM -- reward weight column, fully resident
    out_ref : (tile_b, 1)      f32       -- resident accumulator / final rewards
    """
    k = pl.program_id(1)

    @pl.when(k == 0)
    def _init():
        out_ref[...] = jnp.zeros_like(out_ref)

    # Slice the resident weight column for this reduction step (128-aligned).
    h0 = pl.multiple_of(k * tile_h, tile_h)
    w_tile = w_ref[pl.ds(h0, tile_h), :]                      # (tile_h, 1) bf16

    # MXU contraction over H: bf16 x bf16 with f32 accumulation, straight into
    # the resident output block (its index is independent of k).
    out_ref[...] += lax.dot_general(
        x_ref[...], w_tile,
        dimension_numbers=(((1,), (0,)), ((), ())),
        preferred_element_type=jnp.float32,
    )


# ------------------------------- Wrapper -------------------------------------

@functools.partial(jax.jit, static_argnames=("tile_b_max", "tile_h_max"))
def reward_head(last_hidden, w, b, *, tile_b_max=256, tile_h_max=4096):
    """last_hidden: (R, H) rows of last-token hidden states.
    w: (H, 1) reward weight, b: (1,) reward bias.  Returns (R,) f32 rewards."""
    R, H = last_hidden.shape

    # Batch tiling (sublane dim, multiple of 16 for bf16 packing).  Aim for
    # >= 2 batch tiles when R allows so the v7x megacore "parallel" axis has
    # work to split; small R collapses to a single 16-row tile.
    tile_b = min(tile_b_max, max(16, _round_up(max(R // 2, 1), 16)))
    r_pad = _round_up(R, tile_b)

    # H tiling (lane dim, multiple of 128).  Single step when H fits under
    # tile_h_max; otherwise near-equal multi-MiB reduction tiles.
    h_pad = _round_up(H, 128)
    n_h = -(-h_pad // tile_h_max)
    tile_h = _round_up(-(-h_pad // n_h), 128)
    h_pad = _round_up(h_pad, tile_h)

    # Natural (R, H) layout: one bf16 cast + zero-pad, no transpose copy.
    # Zero padding makes padded H columns / batch rows contribute exactly 0.
    x = jnp.pad(last_hidden.astype(jnp.bfloat16),
                ((0, r_pad - R), (0, h_pad - H)))
    w_p = jnp.pad(w.astype(jnp.bfloat16), ((0, h_pad - H), (0, 0)))

    grid = (r_pad // tile_b, h_pad // tile_h)   # (batch tiles, H reduction tiles)

    out = pl.pallas_call(
        functools.partial(_reward_head_kernel, tile_h=tile_h),
        out_shape=jax.ShapeDtypeStruct((r_pad, 1), jnp.float32),
        grid=grid,
        in_specs=[
            pl.BlockSpec((tile_b, tile_h), lambda i, k: (i, k)),  # hidden tile
            pl.BlockSpec((h_pad, 1), lambda i, k: (0, 0)),        # resident weight
        ],
        out_specs=pl.BlockSpec((tile_b, 1), lambda i, k: (i, 0)),  # resident acc
        compiler_params=pltpu.CompilerParams(
            dimension_semantics=("parallel", "arbitrary"),
        ),
        cost_estimate=pl.CostEstimate(
            flops=2 * r_pad * h_pad,
            transcendentals=0,
            bytes_accessed=r_pad * h_pad * 2 + h_pad * 2 + r_pad * 4,
        ),
    )(x, w_p)

    # Bias is a single scalar: add it here so the kernel stays one fused MXU op.
    return out[:R, 0] + b.astype(jnp.float32)[0]


# ------------------------ Synthetic "base model" (glue) ---------------------

def make_params(key, vocab=50, hidden=32):
    k1, k2, k3, k4 = jax.random.split(key, 4)
    embed = jax.random.normal(k1, (vocab, hidden), jnp.float32) * 0.02
    dense_w = jax.random.normal(k2, (hidden, hidden), jnp.float32) * 0.02
    # reward_layer = nn.Linear(hidden_size, 1): weight stored as (H, 1), bias (1,)
    reward_w = jax.random.normal(k3, (hidden, 1), jnp.float32) * 0.02
    reward_b = jax.random.normal(k4, (1,), jnp.float32) * 0.02
    return embed, dense_w, reward_w, reward_b


def synthetic_base_model(input_ids, attention_mask, embed, dense_w):
    """Tiny deterministic stand-in for the opaque HF base model (plain JAX)."""
    h = embed[input_ids]                                   # (B, S, H)
    h = jnp.tanh(h @ dense_w)                              # one dense "layer"
    if attention_mask is not None:
        h = h * attention_mask[..., None].astype(h.dtype)
    return h


def reward_model_forward(input_ids, attention_mask, params):
    """Matches RewardModel.forward for one batch of sequences."""
    embed, dense_w, reward_w, reward_b = params
    hidden = synthetic_base_model(input_ids, attention_mask, embed, dense_w)
    # hidden_states[-1][:, -1, :]: last-token slice taken in the wrapper so the
    # kernel only ever streams (B, H), never (B, S, H).
    return reward_head(hidden[:, -1, :], reward_w, reward_b)


def reward_model_forward_pair(chosen_ids, rejected_ids, attention_mask, params):
    """chosen + rejected fused into ONE pallas_call (2B stacked rows)."""
    embed, dense_w, reward_w, reward_b = params
    hc = synthetic_base_model(chosen_ids, attention_mask, embed, dense_w)
    hr = synthetic_base_model(rejected_ids, attention_mask, embed, dense_w)
    last = jnp.concatenate([hc[:, -1, :], hr[:, -1, :]], axis=0)   # (2B, H)
    rewards = reward_head(last, reward_w, reward_b)                # (2B,)
    B = chosen_ids.shape[0]
    return rewards[:B], rewards[B:]


def bt_loss(chosen_reward, rejected_reward):
    # The Bradley-Terry reduction is <1 vreg of work: a dedicated pallas_call
    # would be pure launch overhead -- keep it in XLA.
    return -jnp.mean(jax.nn.log_sigmoid(chosen_reward - rejected_reward))


# ---------------------------------- Main -------------------------------------

if __name__ == "__main__":
    key = jax.random.PRNGKey(0)
    B, S, H, V = 2, 8, 32, 50

    kp, kc, kr = jax.random.split(key, 3)
    params = make_params(kp, vocab=V, hidden=H)
    chosen_ids = jax.random.randint(kc, (B, S), 0, V, dtype=jnp.int32)
    rejected_ids = jax.random.randint(kr, (B, S), 0, V, dtype=jnp.int32)
    attention_mask = jnp.ones((B, S), jnp.int32)

    chosen_reward, rejected_reward = reward_model_forward_pair(
        chosen_ids, rejected_ids, attention_mask, params)
    loss = bt_loss(chosen_reward, rejected_reward)
    jax.block_until_ready((chosen_reward, rejected_reward, loss))

    # Plain-JAX reference (same bf16 streaming dtype, f32 accumulation).
    embed, dense_w, reward_w, reward_b = params

    def ref_rewards(ids):
        h = synthetic_base_model(ids, attention_mask, embed, dense_w)
        x = h[:, -1, :].astype(jnp.bfloat16).astype(jnp.float32)
        wv = reward_w.astype(jnp.bfloat16).astype(jnp.float32)[:, 0]
        return jnp.sum(x * wv[None, :], axis=-1) + reward_b[0]

    ref_c = ref_rewards(chosen_ids)
    ref_r = ref_rewards(rejected_ids)
    ref_loss = -jnp.mean(jax.nn.log_sigmoid(ref_c - ref_r))

    assert jnp.allclose(chosen_reward, ref_c, atol=1e-4), (chosen_reward, ref_c)
    assert jnp.allclose(rejected_reward, ref_r, atol=1e-4), (rejected_reward, ref_r)
    assert jnp.allclose(loss, ref_loss, atol=1e-4), (loss, ref_loss)

    print("KERNEL_OK")
</pallas_src>

<mosaic_0001>
module attributes {stable_mosaic.version = 11 : i64} {
  func.func @_reward_head_kernel(%arg0: i32, %arg1: i32, %arg2: memref<16x128xbf16, #tpu.memory_space<vmem>>, %arg3: memref<128x1xbf16, #tpu.memory_space<vmem>>, %arg4: memref<16x1xf32, #tpu.memory_space<vmem>>) attributes {dimension_semantics = [#tpu.dimension_semantics<parallel>, #tpu.dimension_semantics<arbitrary>], iteration_bounds = array<i64: 1, 1>, scalar_prefetch = 0 : i64, scratch_operands = 0 : i64, tpu.core_type = #tpu.core_type<tc>, window_params = [{transform_indices = @transform_0, window_bounds = array<i64: 16, 128>}, {pipeline_mode = #tpu.pipeline_mode<synchronous>, transform_indices = @transform_1, window_bounds = array<i64: 128, 1>}, {transform_indices = @transform_2, window_bounds = array<i64: 16, 1>}]} {
    %c0_i32 = arith.constant 0 : i32
    %0 = arith.cmpi eq, %arg1, %c0_i32 : i32
    %1 = arith.extui %0 : i1 to i32
    %c0_i32_0 = arith.constant 0 : i32
    %2 = arith.cmpi ne, %1, %c0_i32_0 : i32
    scf.if %2 {
      %cst_7 = arith.constant 0.000000e+00 : f32
      %12 = vector.broadcast %cst_7 : f32 to vector<16x1xf32>
      %c0_8 = arith.constant 0 : index
      %c0_9 = arith.constant 0 : index
      %13 = vector.load %arg4[%c0_8, %c0_9] : memref<16x1xf32, #tpu.memory_space<vmem>>, vector<16x1xf32>
      tpu.vector_store %arg4[%c0_8, %c0_9], %12 {strides = array<i32>} : memref<16x1xf32, #tpu.memory_space<vmem>>, vector<16x1xf32>,
    } else {
    }
    %c128_i32 = arith.constant 128 : i32
    %3 = arith.muli %arg1, %c128_i32 : i32
    %4 = tpu.assume_multiple %3, 128 : i32
    %5 = arith.index_cast %4 : i32 to index
    %c0 = arith.constant 0 : index
    %6 = vector.load %arg3[%5, %c0] : memref<128x1xbf16, #tpu.memory_space<vmem>>, vector<128x1xbf16>
    %c0_1 = arith.constant 0 : index
    %c0_2 = arith.constant 0 : index
    %7 = vector.load %arg4[%c0_1, %c0_2] : memref<16x1xf32, #tpu.memory_space<vmem>>, vector<16x1xf32>
    %c0_3 = arith.constant 0 : index
    %c0_4 = arith.constant 0 : index
    %8 = vector.load %arg2[%c0_3, %c0_4] : memref<16x128xbf16, #tpu.memory_space<vmem>>, vector<16x128xbf16>
    %cst = arith.constant dense<0.000000e+00> : vector<16x1xf32>
    %9 = tpu.matmul %8, %6, %cst {dimension_numbers = #tpu.dot_dimension_numbers<[1], [0], [0], [1], [0, 0, 1, 1], [], []>} : vector<16x128xbf16>, vector<128x1xbf16>, vector<16x1xf32> -> vector<16x1xf32>
    %10 = arith.addf %7, %9 : vector<16x1xf32>
    %c0_5 = arith.constant 0 : index
    %c0_6 = arith.constant 0 : index
    %11 = vector.load %arg4[%c0_5, %c0_6] : memref<16x1xf32, #tpu.memory_space<vmem>>, vector<16x1xf32>
    tpu.vector_store %arg4[%c0_5, %c0_6], %10 {strides = array<i32>} : memref<16x1xf32, #tpu.memory_space<vmem>>, vector<16x1xf32>,
    return
  }
  func.func @transform_0(%arg0: i32, %arg1: i32) -> (i32, i32) {
    %c0_i32 = arith.constant 0 : i32
    return %arg0, %arg1 : i32, i32
  }
  func.func @transform_1(%arg0: i32, %arg1: i32) -> (i32, i32) {
    %c0_i32 = arith.constant 0 : i32
    %c0_i32_0 = arith.constant 0 : i32
    %c0_i32_1 = arith.constant 0 : i32
    return %c0_i32, %c0_i32_0 : i32, i32
  }
  func.func @transform_2(%arg0: i32, %arg1: i32) -> (i32, i32) {
    %c0_i32 = arith.constant 0 : i32
    %c0_i32_0 = arith.constant 0 : i32
    return %arg0, %c0_i32 : i32, i32
  }
}

</mosaic_0001>

<bundles_post_ra>
// kernel: reward_head.1
= control target key start
LH: loop header
LB: loop body
LE: loop exit
PB: predicated region body
PF: predicated region fallthrough
CT: control target
= control target key end

     0   :  { %vm15_vm0 = vcmask 7168   ;;  %v168_v2 = vmov 0.0   ;;  %s233_s1 = inlined_call_operand.vmem [shape: bf16[128,1], index: 1, kind: input, shape index: {}]   ;;  %s234_s2 = inlined_call_operand.vmem [shape: f32[16,1], index: 2, kind: output, shape index: {}]   ;;  %s235_s0 = inlined_call_operand.vmem [shape: bf16[16,128], index: 0, kind: input, shape index: {}]  }
   0x1   :  { %v165_v0 = vld [vmem:[%s233_s1 + $0x38] sm:$0xff]  ;;  %v164_v1 = vld [vmem:[%s233_s1 + $0x30] sm:$0xff]  ;;  %16 = vst.msk [vmem:[%s234_s2] sm:$0xff] %vm15_vm0, %v168_v2  ;;  %v163_v3 = vld [vmem:[%s233_s1 + $0x28] sm:$0xff] }
   0x2   :  { %97 = vmatpush.bf16.msra.mxu0 %v165_v0  ;;  %17 = vst.msk [vmem:[%s234_s2 + $0x8] sm:$0xff] %vm15_vm0, %v168_v2  ;;  %v162_v4 = vld [vmem:[%s233_s1 + $0x20] sm:$0xff]  ;;  %v161_v5 = vld [vmem:[%s233_s1 + $0x18] sm:$0xff]  ;;  %v160_v6 = vld [vmem:[%s233_s1 + $0x10] sm:$0xff] }
   0x3   :  { %v159_v7 = vld [vmem:[%s233_s1 + $0x8] sm:$0xff]  ;;  %v158_v8 = vld [vmem:[%s233_s1] sm:$0xff] }
   0x4   :  { %v166_v9 = vld [vmem:[%s235_s0] sm:$0xff] }
   0x6   :  { %98 = vmatpush.bf16.msra.mxu0 %v164_v1 }
   0x8   :  { %v39_v10 = vld [vmem:[%s234_s2] sm:$0xff] }
   0x9   :  { %v40_v13 = vld [vmem:[%s234_s2 + $0x8] sm:$0xff] }
   0xa   :  { %99 = vmatpush.bf16.msra.mxu0 %v163_v3 }
   0xe   :  { %100 = vmatpush.bf16.msra.mxu0 %v162_v4 }
  0x12   :  { %101 = vmatpush.bf16.msra.mxu0 %v161_v5 }
  0x16   :  { %102 = vmatpush.bf16.msra.mxu0 %v160_v6 }
  0x1a   :  { %103 = vmatpush.bf16.msra.mxu0 %v159_v7 }
  0x1e   :  { %104 = vmatpush.bf16.msra.mxu0 %v158_v8 }
  0x21   :  { %105 = vmatmul.bf16.vlgmr.msra.gmra.mxu0 %v166_v9 }
  0x9e   :  { %v106_v11 = vpop.f32.mrf.mxu0 }
  0x9f   :  { %v111_v12 = vadd.f32 %v106_v11, %v39_v10 }
  0xa1   :  { %114 = vst.msk [vmem:[%s234_s2] sm:$0xff] %vm15_vm0, %v111_v12 }
  0xa6   :  { %v108_v14 = vpop.f32.mrf.mxu0 }
  0xa7   :  { %v112_v15 = vadd.f32 %v108_v14, %v40_v13 }
  0xa9   :  { %115 = vst.msk [vmem:[%s234_s2 + $0x8] sm:$0xff] %vm15_vm0, %v112_v15 }

</bundles_post_ra>
